<compile_context>
chip_gen: v6e
topology: v6e:2x2x1
jax: 0.10.0
libtpu: 0.0.40
codegen_flags: <defaults>
</compile_context>

<pallas_src>
import functools

import jax
import jax.numpy as jnp
from jax.experimental import pallas as pl
from jax.experimental.pallas import tpu as pltpu

SMOOTH = 0.001
LANE = 128
SUBLANE = 8
TR_CAP = 2048   # 2 inputs x 2 buffers x (2048*128*4B) = 4 MiB f32: fits every gen.


def _round_up(x, m):
    return ((x + m - 1) // m) * m


def _choose_tiling(R, B):
    """Pick (tr, S, K): rows per tile, parallel row splits, reduction steps/split."""
    # If the batch axis alone cannot feed two TensorCores (v7x), split the row
    # axis into two parallel contiguous halves.  Costs nothing on v5e/v6e.
    if B == 1 and R >= 64:
        tr = min(TR_CAP, _round_up(pl.cdiv(R, 2), 32))   # mult of 32: ok for f32/bf16/i8
        n_blocks = pl.cdiv(R, tr)
        if n_blocks % 2 == 0:
            return tr, 2, n_blocks // 2
    if R <= TR_CAP:
        return R, 1, 1                     # single full-extent block, no tail
    return TR_CAP, 1, pl.cdiv(R, TR_CAP)


def _dice_sums_kernel(p_ref, t_ref, inter_ref, sp_ref, st_ref, *,
                      tr, blocks_per_split, valid_rows, need_mask):
    """Accumulate per-(batch, split) partial sums over the reduction axis k.

    p_ref, t_ref      : (1, tr, 128) tiles of logits / targets (native dtype).
    inter/sp/st_ref   : (1, 1, 8, 128) f32 accumulators, resident across k.
    """
    k = pl.program_id(2)

    @pl.when(k == 0)
    def _():
        inter_ref[...] = jnp.zeros_like(inter_ref)
        sp_ref[...] = jnp.zeros_like(sp_ref)
        st_ref[...] = jnp.zeros_like(st_ref)

    p = jax.nn.sigmoid(p_ref[0].astype(jnp.float32))     # (tr, 128)
    t = t_ref[0].astype(jnp.float32)

    if need_mask:
        s = pl.program_id(1)
        row0 = (s * blocks_per_split + k) * tr
        rows = row0 + jax.lax.broadcasted_iota(jnp.int32, (tr, LANE), 0)
        valid = rows < valid_rows
        zero = jnp.zeros_like(p)
        p = jnp.where(valid, p, zero)                    # select (NaN-safe)
        t = jnp.where(valid, t, zero)

    def psum8(v):
        # Sublane-aligned partial sums: (tr, 128) -> (8, 128), VPU adds only.
        if tr % SUBLANE == 0:
            return v.reshape(tr // SUBLANE, SUBLANE, LANE).sum(axis=0)
        # Tiny single-block case (tr == R, not a multiple of 8).
        row = v.sum(axis=0, keepdims=True)
        return jnp.pad(row, ((0, SUBLANE - 1), (0, 0)))

    inter_ref[...] += psum8(p * t)[None, None]
    sp_ref[...] += psum8(p)[None, None]
    st_ref[...] += psum8(t)[None, None]


def _dice_sums(p3, t3, *, tr, n_splits, blocks_per_split):
    """p3, t3: (B, R, 128) native dtype.  Returns three (B, S, 8, 128) f32 partials."""
    B, R, _ = p3.shape
    S, K = n_splits, blocks_per_split
    need_mask = (S * K * tr != R)

    kernel = functools.partial(
        _dice_sums_kernel, tr=tr, blocks_per_split=K,
        valid_rows=R, need_mask=need_mask)

    in_spec = pl.BlockSpec((1, tr, LANE), lambda b, s, k: (b, s * K + k, 0))
    out_spec = pl.BlockSpec((1, 1, SUBLANE, LANE), lambda b, s, k: (b, s, 0, 0))
    out_sds = jax.ShapeDtypeStruct((B, S, SUBLANE, LANE), jnp.float32)

    return pl.pallas_call(
        kernel,
        out_shape=(out_sds, out_sds, out_sds),
        grid_spec=pltpu.PrefetchScalarGridSpec(
            num_scalar_prefetch=0,
            grid=(B, S, K),
            in_specs=[in_spec, in_spec],
            out_specs=(out_spec, out_spec, out_spec),
        ),
        compiler_params=pltpu.CompilerParams(
            dimension_semantics=("parallel", "parallel", "arbitrary")
        ),
    )(p3, t3)


@functools.partial(jax.jit, static_argnames=("class_id",))
def soft_dice_coef(inputs, target, class_id=None, smooth=SMOOTH):
    """Pallas equivalent of SoftDiceCoef.forward (inputs are logits, NCHW)."""
    if class_id is not None:
        inputs = inputs[:, class_id]
        target = target[:, class_id]

    B = inputs.shape[0]
    p_flat = inputs.reshape(B, -1)          # native dtype, metadata-only reshape
    t_flat = target.reshape(B, -1)
    N = p_flat.shape[1]

    # Only if N is not lane-aligned do we pay a (minimal) pad: sigmoid(-1e4) == 0
    # and target pad == 0, so padding contributes nothing to any sum.
    if N % LANE != 0:
        pad = LANE - N % LANE
        p_flat = jnp.pad(p_flat, ((0, 0), (0, pad)), constant_values=-1e4)
        t_flat = jnp.pad(t_flat, ((0, 0), (0, pad)))
        N += pad

    R = N // LANE
    p3 = p_flat.reshape(B, R, LANE)
    t3 = t_flat.reshape(B, R, LANE)

    tr, S, K = _choose_tiling(R, B)
    inter, sum_p, sum_t = _dice_sums(p3, t3, tr=tr, n_splits=S, blocks_per_split=K)

    inter = inter.sum(axis=(1, 2, 3))       # tiny (B, S, 8, 128) collapse in JAX
    sum_p = sum_p.sum(axis=(1, 2, 3))
    sum_t = sum_t.sum(axis=(1, 2, 3))
    return jnp.mean((2.0 * inter + smooth) / (sum_p + sum_t + smooth))


def _reference(inputs, target, class_id=None, smooth=SMOOTH):
    if class_id is not None:
        inputs = inputs[:, class_id]
        target = target[:, class_id]
    p = jax.nn.sigmoid(inputs.reshape(inputs.shape[0], -1).astype(jnp.float32))
    t = target.reshape(target.shape[0], -1).astype(jnp.float32)
    inter = jnp.sum(p * t, axis=1)
    return jnp.mean((2.0 * inter + smooth) /
                    (p.sum(axis=1) + t.sum(axis=1) + smooth))


if __name__ == "__main__":
    key = jax.random.PRNGKey(0)
    k1, k2, k3, k4, k5, k6 = jax.random.split(key, 6)

    # 1) Default path: NCHW f32, B=2, C=4, 16x16 -> N=1024, R=8, single block.
    B, C, H, W = 2, 4, 16, 16
    logits = jax.random.normal(k1, (B, C, H, W), dtype=jnp.float32)
    target = (jax.random.uniform(k2, (B, C, H, W)) > 0.5).astype(jnp.float32)
    out = jax.block_until_ready(soft_dice_coef(logits, target))
    ref = _reference(logits, target)
    assert jnp.allclose(out, ref, rtol=1e-5, atol=1e-5), (out, ref)

    # 2) class_id selection (R = 2, full-extent tiny block path).
    out_c = jax.block_until_ready(soft_dice_coef(logits, target, class_id=1))
    ref_c = _reference(logits, target, class_id=1)
    assert jnp.allclose(out_c, ref_c, rtol=1e-5, atol=1e-5), (out_c, ref_c)

    # 3) B=1, larger spatial -> 2-way parallel row split (v7x path) + tail mask.
    lg1 = jax.random.normal(k3, (1, 3, 64, 64), dtype=jnp.float32)
    tg1 = (jax.random.uniform(k4, (1, 3, 64, 64)) > 0.5).astype(jnp.float32)
    out1 = jax.block_until_ready(soft_dice_coef(lg1, tg1))
    ref1 = _reference(lg1, tg1)
    assert jnp.allclose(out1, ref1, rtol=1e-5, atol=1e-5), (out1, ref1)

    # 4) N not a multiple of 128 -> minimal lane-pad fallback.
    lg2 = jax.random.normal(k5, (2, 3, 10, 10), dtype=jnp.float32)
    tg2 = (jax.random.uniform(k6, (2, 3, 10, 10)) > 0.5).astype(jnp.float32)
    out2 = jax.block_until_ready(soft_dice_coef(lg2, tg2))
    ref2 = _reference(lg2, tg2)
    assert jnp.allclose(out2, ref2, rtol=1e-5, atol=1e-5), (out2, ref2)

    # 5) Narrow native dtype (bf16) streamed without any wrapper upcast.
    lg3 = jax.random.normal(k1, (2, 4, 32, 32), dtype=jnp.bfloat16)
    tg3 = (jax.random.uniform(k2, (2, 4, 32, 32)) > 0.5).astype(jnp.bfloat16)
    out3 = jax.block_until_ready(soft_dice_coef(lg3, tg3))
    ref3 = _reference(lg3, tg3)
    assert jnp.allclose(out3, ref3, rtol=1e-3, atol=1e-3), (out3, ref3)

    print("KERNEL_OK")
</pallas_src>

<mosaic_0001>
module attributes {stable_mosaic.version = 11 : i64} {
  func.func @_dice_sums_kernel(%arg0: i32, %arg1: i32, %arg2: i32, %arg3: memref<1x8x128xf32, #tpu.memory_space<vmem>>, %arg4: memref<1x8x128xf32, #tpu.memory_space<vmem>>, %arg5: memref<1x1x8x128xf32, #tpu.memory_space<vmem>>, %arg6: memref<1x1x8x128xf32, #tpu.memory_space<vmem>>, %arg7: memref<1x1x8x128xf32, #tpu.memory_space<vmem>>) attributes {dimension_semantics = [#tpu.dimension_semantics<parallel>, #tpu.dimension_semantics<parallel>, #tpu.dimension_semantics<arbitrary>], iteration_bounds = array<i64: 2, 1, 1>, scalar_prefetch = 0 : i64, scratch_operands = 0 : i64, tpu.core_type = #tpu.core_type<tc>, window_params = [{transform_indices = @transform_0, window_bounds = array<i64: 1, 8, 128>}, {transform_indices = @transform_1, window_bounds = array<i64: 1, 8, 128>}, {transform_indices = @transform_2, window_bounds = array<i64: 1, 1, 8, 128>}, {transform_indices = @transform_3, window_bounds = array<i64: 1, 1, 8, 128>}, {transform_indices = @transform_4, window_bounds = array<i64: 1, 1, 8, 128>}]} {
    %c0_i32 = arith.constant 0 : i32
    %0 = arith.cmpi eq, %arg2, %c0_i32 : i32
    %1 = arith.extui %0 : i1 to i32
    %c0_i32_0 = arith.constant 0 : i32
    %2 = arith.cmpi ne, %1, %c0_i32_0 : i32
    scf.if %2 {
      %cst_33 = arith.constant 0.000000e+00 : f32
      %31 = vector.broadcast %cst_33 : f32 to vector<1x1x8x128xf32>
      %c0_34 = arith.constant 0 : index
      %c0_35 = arith.constant 0 : index
      %c0_36 = arith.constant 0 : index
      %c0_37 = arith.constant 0 : index
      %32 = vector.load %arg5[%c0_34, %c0_35, %c0_36, %c0_37] : memref<1x1x8x128xf32, #tpu.memory_space<vmem>>, vector<1x1x8x128xf32>
      tpu.vector_store %arg5[%c0_34, %c0_35, %c0_36, %c0_37], %31 {strides = array<i32>} : memref<1x1x8x128xf32, #tpu.memory_space<vmem>>, vector<1x1x8x128xf32>,
      %cst_38 = arith.constant 0.000000e+00 : f32
      %33 = vector.broadcast %cst_38 : f32 to vector<1x1x8x128xf32>
      %c0_39 = arith.constant 0 : index
      %c0_40 = arith.constant 0 : index
      %c0_41 = arith.constant 0 : index
      %c0_42 = arith.constant 0 : index
      %34 = vector.load %arg6[%c0_39, %c0_40, %c0_41, %c0_42] : memref<1x1x8x128xf32, #tpu.memory_space<vmem>>, vector<1x1x8x128xf32>
      tpu.vector_store %arg6[%c0_39, %c0_40, %c0_41, %c0_42], %33 {strides = array<i32>} : memref<1x1x8x128xf32, #tpu.memory_space<vmem>>, vector<1x1x8x128xf32>,
      %cst_43 = arith.constant 0.000000e+00 : f32
      %35 = vector.broadcast %cst_43 : f32 to vector<1x1x8x128xf32>
      %c0_44 = arith.constant 0 : index
      %c0_45 = arith.constant 0 : index
      %c0_46 = arith.constant 0 : index
      %c0_47 = arith.constant 0 : index
      %36 = vector.load %arg7[%c0_44, %c0_45, %c0_46, %c0_47] : memref<1x1x8x128xf32, #tpu.memory_space<vmem>>, vector<1x1x8x128xf32>
      tpu.vector_store %arg7[%c0_44, %c0_45, %c0_46, %c0_47], %35 {strides = array<i32>} : memref<1x1x8x128xf32, #tpu.memory_space<vmem>>, vector<1x1x8x128xf32>,
    } else {
    }
    %c0 = arith.constant 0 : index
    %c0_1 = arith.constant 0 : index
    %c0_2 = arith.constant 0 : index
    %3 = vector.load %arg3[%c0, %c0_1, %c0_2] : memref<1x8x128xf32, #tpu.memory_space<vmem>>, vector<1x8x128xf32>
    %4 = vector.shape_cast %3 : vector<1x8x128xf32> to vector<8x128xf32>
    %5 = arith.negf %4 : vector<8x128xf32>
    %6 = math.exp %5 : vector<8x128xf32>
    %cst = arith.constant 1.000000e+00 : f32
    %7 = vector.broadcast %cst : f32 to vector<8x128xf32>
    %8 = arith.addf %7, %6 : vector<8x128xf32>
    %9 = arith.divf %7, %8 : vector<8x128xf32>
    %c0_3 = arith.constant 0 : index
    %c0_4 = arith.constant 0 : index
    %c0_5 = arith.constant 0 : index
    %10 = vector.load %arg4[%c0_3, %c0_4, %c0_5] : memref<1x8x128xf32, #tpu.memory_space<vmem>>, vector<1x8x128xf32>
    %11 = vector.shape_cast %10 : vector<1x8x128xf32> to vector<8x128xf32>
    %c0_6 = arith.constant 0 : index
    %c0_7 = arith.constant 0 : index
    %c0_8 = arith.constant 0 : index
    %c0_9 = arith.constant 0 : index
    %12 = vector.load %arg5[%c0_6, %c0_7, %c0_8, %c0_9] : memref<1x1x8x128xf32, #tpu.memory_space<vmem>>, vector<1x1x8x128xf32>
    %13 = arith.mulf %9, %11 : vector<8x128xf32>
    %14 = vector.shape_cast %13 : vector<8x128xf32> to vector<1x8x128xf32>
    %cst_10 = arith.constant dense<0.000000e+00> : vector<8x128xf32>
    %15 = vector.multi_reduction <add>, %14, %cst_10 [0] : vector<1x8x128xf32> to vector<8x128xf32>
    %16 = vector.shape_cast %15 : vector<8x128xf32> to vector<1x1x8x128xf32>
    %17 = arith.addf %12, %16 : vector<1x1x8x128xf32>
    %c0_11 = arith.constant 0 : index
    %c0_12 = arith.constant 0 : index
    %c0_13 = arith.constant 0 : index
    %c0_14 = arith.constant 0 : index
    %18 = vector.load %arg5[%c0_11, %c0_12, %c0_13, %c0_14] : memref<1x1x8x128xf32, #tpu.memory_space<vmem>>, vector<1x1x8x128xf32>
    tpu.vector_store %arg5[%c0_11, %c0_12, %c0_13, %c0_14], %17 {strides = array<i32>} : memref<1x1x8x128xf32, #tpu.memory_space<vmem>>, vector<1x1x8x128xf32>,
    %c0_15 = arith.constant 0 : index
    %c0_16 = arith.constant 0 : index
    %c0_17 = arith.constant 0 : index
    %c0_18 = arith.constant 0 : index
    %19 = vector.load %arg6[%c0_15, %c0_16, %c0_17, %c0_18] : memref<1x1x8x128xf32, #tpu.memory_space<vmem>>, vector<1x1x8x128xf32>
    %20 = vector.shape_cast %9 : vector<8x128xf32> to vector<1x8x128xf32>
    %cst_19 = arith.constant dense<0.000000e+00> : vector<8x128xf32>
    %21 = vector.multi_reduction <add>, %20, %cst_19 [0] : vector<1x8x128xf32> to vector<8x128xf32>
    %22 = vector.shape_cast %21 : vector<8x128xf32> to vector<1x1x8x128xf32>
    %23 = arith.addf %19, %22 : vector<1x1x8x128xf32>
    %c0_20 = arith.constant 0 : index
    %c0_21 = arith.constant 0 : index
    %c0_22 = arith.constant 0 : index
    %c0_23 = arith.constant 0 : index
    %24 = vector.load %arg6[%c0_20, %c0_21, %c0_22, %c0_23] : memref<1x1x8x128xf32, #tpu.memory_space<vmem>>, vector<1x1x8x128xf32>
    tpu.vector_store %arg6[%c0_20, %c0_21, %c0_22, %c0_23], %23 {strides = array<i32>} : memref<1x1x8x128xf32, #tpu.memory_space<vmem>>, vector<1x1x8x128xf32>,
    %c0_24 = arith.constant 0 : index
    %c0_25 = arith.constant 0 : index
    %c0_26 = arith.constant 0 : index
    %c0_27 = arith.constant 0 : index
    %25 = vector.load %arg7[%c0_24, %c0_25, %c0_26, %c0_27] : memref<1x1x8x128xf32, #tpu.memory_space<vmem>>, vector<1x1x8x128xf32>
    %26 = vector.shape_cast %11 : vector<8x128xf32> to vector<1x8x128xf32>
    %cst_28 = arith.constant dense<0.000000e+00> : vector<8x128xf32>
    %27 = vector.multi_reduction <add>, %26, %cst_28 [0] : vector<1x8x128xf32> to vector<8x128xf32>
    %28 = vector.shape_cast %27 : vector<8x128xf32> to vector<1x1x8x128xf32>
    %29 = arith.addf %25, %28 : vector<1x1x8x128xf32>
    %c0_29 = arith.constant 0 : index
    %c0_30 = arith.constant 0 : index
    %c0_31 = arith.constant 0 : index
    %c0_32 = arith.constant 0 : index
    %30 = vector.load %arg7[%c0_29, %c0_30, %c0_31, %c0_32] : memref<1x1x8x128xf32, #tpu.memory_space<vmem>>, vector<1x1x8x128xf32>
    tpu.vector_store %arg7[%c0_29, %c0_30, %c0_31, %c0_32], %29 {strides = array<i32>} : memref<1x1x8x128xf32, #tpu.memory_space<vmem>>, vector<1x1x8x128xf32>,
    return
  }
  func.func @transform_0(%arg0: i32, %arg1: i32, %arg2: i32) -> (i32, i32, i32) {
    %c1_i32 = arith.constant 1 : i32
    %0 = arith.muli %arg1, %c1_i32 : i32
    %1 = arith.addi %0, %arg2 : i32
    %c0_i32 = arith.constant 0 : i32
    %c0_i32_0 = arith.constant 0 : i32
    return %arg0, %1, %c0_i32 : i32, i32, i32
  }
  func.func @transform_1(%arg0: i32, %arg1: i32, %arg2: i32) -> (i32, i32, i32) {
    %c1_i32 = arith.constant 1 : i32
    %0 = arith.muli %arg1, %c1_i32 : i32
    %1 = arith.addi %0, %arg2 : i32
    %c0_i32 = arith.constant 0 : i32
    %c0_i32_0 = arith.constant 0 : i32
    return %arg0, %1, %c0_i32 : i32, i32, i32
  }
  func.func @transform_2(%arg0: i32, %arg1: i32, %arg2: i32) -> (i32, i32, i32, i32) {
    %c0_i32 = arith.constant 0 : i32
    %c0_i32_0 = arith.constant 0 : i32
    %c0_i32_1 = arith.constant 0 : i32
    return %arg0, %arg1, %c0_i32, %c0_i32_0 : i32, i32, i32, i32
  }
  func.func @transform_3(%arg0: i32, %arg1: i32, %arg2: i32) -> (i32, i32, i32, i32) {
    %c0_i32 = arith.constant 0 : i32
    %c0_i32_0 = arith.constant 0 : i32
    %c0_i32_1 = arith.constant 0 : i32
    return %arg0, %arg1, %c0_i32, %c0_i32_0 : i32, i32, i32, i32
  }
  func.func @transform_4(%arg0: i32, %arg1: i32, %arg2: i32) -> (i32, i32, i32, i32) {
    %c0_i32 = arith.constant 0 : i32
    %c0_i32_0 = arith.constant 0 : i32
    %c0_i32_1 = arith.constant 0 : i32
    return %arg0, %arg1, %c0_i32, %c0_i32_0 : i32, i32, i32, i32
  }
}

</mosaic_0001>

<bundles_post_ra>
// kernel: soft_dice_coef.1
= control target key start
LH: loop header
LB: loop body
LE: loop exit
PB: predicated region body
PF: predicated region fallthrough
CT: control target
= control target key end

     0   :  { %s603_s15 = smov 0   ;;  %s605_s16 = smov 0   ;;  %s642_s0 = inlined_call_operand.vmem [shape: f32[2,8,128], index: 0, kind: input, shape index: {}]   ;;  %s643_s1 = inlined_call_operand.vmem [shape: f32[2,8,128], index: 1, kind: input, shape index: {}]   ;;  %s644_s2 = inlined_call_operand.vmem [shape: f32[2,1,8,128], index: 2, kind: output, shape index: {0}]   ;;  %s645_s3 = inlined_call_operand.vmem [shape: f32[2,1,8,128], index: 3, kind: output, shape index: {1}]   ;;  %s646_s4 = inlined_call_operand.vmem [shape: f32[2,1,8,128], index: 4, kind: output, shape index: {2}]  }
   0x1   :  { %s607_s17 = smov 0  }
   0x2 LB: > { %s34_s18 = sadd.s32 1, %s572_s16  ;;  %p516_p0 = scmp.ge.s32.totalorder %s576_s17, 1  ;;  %s576_s17 = sphi %s607_s17, %s15_s17   ;;  %s572_s16 = sphi %s605_s16, %s648_s16   ;;  %s568_s15 = sphi %s603_s15, %s647_s15  }
   0x3   : > { %p36_p1 = scmp.ge.s32.totalorder %s34_s18, 2  ;;  %p218_p2 = scmp.lt.s32.totalorder %s576_s17, 3 }
   0x5   : > { %s650_s18 = smov (%p36_p1, %s34_s18), 0  ;;  %p219_p3 = pnand %p516_p0, %p218_p2 }
   0x6   : > { %p272_p4 = scmp.lt.s32.totalorder (!%p219_p3), %s568_s15, 1 }
   0x7   : > { %222 = sbr.rel (%p219_p3) target bundleno = 51 (0x33), region = 28 }
   0xc   : > { %s652_s15 = smov (!%p272_p4, %s568_s15), 1 }
   0xd   : > { %s517_s19 = sshll.u32 %s652_s15, 3 }
   0xe   : > { %s278_s22 = scalar_lea.vmem %s642_s0, %s517_s19  ;;  %s287_s25 = scalar_lea.vmem %s643_s1, %s517_s19 }
   0xf   : > { %v317_v0 = vld [vmem:[%s278_s22] sm:$0xff]  ;;  %s309_s28 = scalar_lea.vmem %s646_s4, %s517_s19  ;;  %s302_s5 = scalar_lea.vmem %s645_s3, %s517_s19 }
  0x10   : > { %v522_v1 = vmul.f32 -1.442695, %v317_v0  ;;  %v324_v2 = vld [vmem:[%s287_s25] sm:$0xff]  ;;  %s295_s8 = scalar_lea.vmem %s644_s2, %s517_s19 }
  0x11   : > { %337 = vst [vmem:[%s309_s28] sm:$0xff] %v324_v2 }
  0x12   : > { %550 = vpow2.f32 %v522_v1 }
  0x1f   : > { %v551_v3 = vpop.eup %550 }
  0x20   : > { %v321_v4 = vadd.f32 1.0, %v551_v3 }
  0x22   : > { %552 = vrcp.f32 %v321_v4 }
  0x2f   : > { %v553_v5 = vpop.eup %552 }
  0x30   : > { %v326_v6 = vmul.f32 %v553_v5, %v324_v2  ;;  %333 = vst [vmem:[%s302_s5] sm:$0xff] %v553_v5 }
  0x32   : > { %329 = vst [vmem:[%s295_s8] sm:$0xff] %v326_v6 }
  0x33 PF: > { %s15_s17 = sadd.s32 1, %s576_s17   ;;  %s647_s15 = smov %s572_s16 }
  0x34   : > { %p12_p5 = scmp.ge.s32.totalorder %s15_s17, 4   ;;  %s648_s16 = smov %s650_s18 }
  0x36   :  { %14 = sbr.rel (!%p12_p5) target bundleno = 2 (0x2), region = 89 }

</bundles_post_ra>
